<compile_context>
chip_gen: v7x
topology: tpu7x:2x2x1
jax: 0.10.0
libtpu: 0.0.40
codegen_flags: <defaults>
</compile_context>

<pallas_src>
import jax
import jax.numpy as jnp
from jax.experimental import pallas as pl
from jax.experimental.pallas import tpu as pltpu


def make_kernel(k):
    k = jnp.asarray(k, dtype=jnp.float32)
    if k.ndim == 1:
        k = k[None, :] * k[:, None]
    k = k / jnp.sum(k)
    return k


def _make_blur_body(wy, wx, h, w, ho, wo, pad0):
    """wy / wx: already-flipped 1-D taps (Python floats) for true convolution."""
    kh, kw = len(wy), len(wx)

    def body(x_ref, o_ref, xpad_ref):
        # x_ref:    (h, w, pb)   unpadded planes; planes on the lane axis
        # o_ref:    (ho, wo, pb) output planes
        # xpad_ref: (hp, wp, pb) f32 scratch; zero borders realize the upfirdn2d pad
        xpad_ref[...] = jnp.zeros_like(xpad_ref)  # cheap VMEM memset, keeps borders zero
        xpad_ref[pad0:pad0 + h, pad0:pad0 + w, :] = x_ref[...].astype(jnp.float32)

        # Horizontal pass: shifts along W (sublane axis).
        tmp = wx[0] * xpad_ref[:, 0:wo, :]
        for kx in range(1, kw):
            tmp = tmp + wx[kx] * xpad_ref[:, kx:kx + wo, :]

        # Vertical pass: shifts along H (leading axis -> free row offsets).
        acc = wy[0] * tmp[0:ho, :, :]
        for ky in range(1, kh):
            acc = acc + wy[ky] * tmp[ky:ky + ho, :, :]

        o_ref[...] = acc.astype(o_ref.dtype)

    return body


def _choose_plane_block(p, hp, wp, bytes_target=2 * 1024 * 1024):
    """Largest lane-dense plane tile (multiple of 128 dividing p) whose padded f32
    scratch stays under bytes_target; if p is not a multiple of 128, take all planes."""
    if p % 128 != 0:
        return p
    best = 128
    m = 1
    while m * 128 <= p:
        cand = m * 128
        if p % cand == 0 and hp * wp * cand * 4 <= bytes_target:
            best = cand
        m += 1
    return best


def blur_stylegan2(x, kernel_1d=(1, 3, 3, 1), pad=(2, 1), upsample_factor=1):
    """Pallas implementation of Blur_StyleGAN2.forward for NCHW input."""
    kernel_1d = tuple(float(v) for v in kernel_1d)
    s = sum(kernel_1d)
    # make_kernel: outer(k,k)/sum(outer) == outer(k/s, k/s); upsample scaling of the
    # 2-D kernel by factor**2 == scaling each 1-D factor by `factor`.
    taps = [v / s * float(upsample_factor) for v in kernel_1d]
    wflip = tuple(reversed(taps))  # true convolution flips the kernel
    kh = kw = len(wflip)

    pad0, pad1 = pad
    assert pad0 >= 0 and pad1 >= 0  # TODO(synk): negative pads (crop) unused by Blur_StyleGAN2

    n, c, h, w = x.shape
    p = n * c
    hp, wp = h + pad0 + pad1, w + pad0 + pad1
    ho, wo = hp - kh + 1, wp - kw + 1

    # Lane-dense layout: plane axis (N*C) on lanes, spatial dims on row/sublane axes.
    xt = jnp.transpose(x, (2, 3, 0, 1)).reshape(h, w, p)

    pb = _choose_plane_block(p, hp, wp)
    grid = (p // pb,)
    # TODO(synk): very large spatial extents with pb=128 would need an additional
    # halo'd H-tiling to stay within v7x's 64 MiB VMEM; not needed at these shapes.

    out = pl.pallas_call(
        _make_blur_body(wflip, wflip, h, w, ho, wo, pad0),
        out_shape=jax.ShapeDtypeStruct((ho, wo, p), x.dtype),
        grid=grid,
        in_specs=[pl.BlockSpec((h, w, pb), lambda i: (0, 0, i))],
        out_specs=pl.BlockSpec((ho, wo, pb), lambda i: (0, 0, i)),
        scratch_shapes=[pltpu.VMEM((hp, wp, pb), jnp.float32)],
        compiler_params=pltpu.CompilerParams(
            dimension_semantics=("parallel",),
            vmem_limit_bytes=32 * 1024 * 1024,
        ),
    )(xt)

    return jnp.transpose(out.reshape(ho, wo, n, c), (2, 3, 0, 1))


def _reference(x, kernel_1d=(1, 3, 3, 1), pad=(2, 1), upsample_factor=1):
    """Pure-JAX reference (shifted-sum true convolution), mirrors upfirdn2d up=down=1."""
    k = make_kernel(list(kernel_1d))
    if upsample_factor > 1:
        k = k * (upsample_factor ** 2)
    kh, kw = k.shape
    pad0, pad1 = pad
    n, c, h, w = x.shape
    hp, wp = h + pad0 + pad1, w + pad0 + pad1
    ho, wo = hp - kh + 1, wp - kw + 1
    xp = jnp.pad(x, ((0, 0), (0, 0), (pad0, pad1), (pad0, pad1)))
    out = jnp.zeros((n, c, ho, wo), jnp.float32)
    for ky in range(kh):
        for kx in range(kw):
            out = out + k[kh - 1 - ky, kw - 1 - kx] * xp[:, :, ky:ky + ho, kx:kx + wo]
    return out.astype(x.dtype)


if __name__ == "__main__":
    key = jax.random.PRNGKey(0)
    x = jax.random.normal(key, (2, 4, 16, 16), dtype=jnp.float32)

    out = blur_stylegan2(x, kernel_1d=(1, 3, 3, 1), pad=(2, 1), upsample_factor=1)
    out = jax.block_until_ready(out)

    ref = _reference(x, kernel_1d=(1, 3, 3, 1), pad=(2, 1), upsample_factor=1)
    assert out.shape == (2, 4, 16, 16), out.shape
    assert jnp.allclose(out, ref, atol=1e-5, rtol=1e-5), float(jnp.max(jnp.abs(out - ref)))

    print("KERNEL_OK")
</pallas_src>

<mosaic_0001>
module attributes {stable_mosaic.version = 11 : i64} {
  func.func @body(%arg0: i32, %arg1: memref<16x16x8xf32, #tpu.memory_space<vmem>>, %arg2: memref<16x16x8xf32, #tpu.memory_space<vmem>>, %arg3: memref<19x19x8xf32, #tpu.memory_space<vmem>>) attributes {dimension_semantics = [#tpu.dimension_semantics<parallel>], iteration_bounds = array<i64: 1>, scalar_prefetch = 0 : i64, scratch_operands = 1 : i64, tpu.core_type = #tpu.core_type<tc>, window_params = [{transform_indices = @transform_0, window_bounds = array<i64: 16, 16, 8>}, {transform_indices = @transform_1, window_bounds = array<i64: 16, 16, 8>}]} {
    %cst = arith.constant 0.000000e+00 : f32
    %0 = vector.broadcast %cst : f32 to vector<19x19x8xf32>
    %c0 = arith.constant 0 : index
    %c0_0 = arith.constant 0 : index
    %c0_1 = arith.constant 0 : index
    %1 = vector.load %arg3[%c0, %c0_0, %c0_1] : memref<19x19x8xf32, #tpu.memory_space<vmem>>, vector<19x19x8xf32>
    tpu.vector_store %arg3[%c0, %c0_0, %c0_1], %0 {strides = array<i32>} : memref<19x19x8xf32, #tpu.memory_space<vmem>>, vector<19x19x8xf32>,
    %c0_2 = arith.constant 0 : index
    %c0_3 = arith.constant 0 : index
    %c0_4 = arith.constant 0 : index
    %2 = vector.load %arg1[%c0_2, %c0_3, %c0_4] : memref<16x16x8xf32, #tpu.memory_space<vmem>>, vector<16x16x8xf32>
    %c2 = arith.constant 2 : index
    %c2_5 = arith.constant 2 : index
    %c0_6 = arith.constant 0 : index
    %3 = vector.load %arg3[%c2, %c2_5, %c0_6] : memref<19x19x8xf32, #tpu.memory_space<vmem>>, vector<16x16x8xf32>
    tpu.vector_store %arg3[%c2, %c2_5, %c0_6], %2 {strides = array<i32>} : memref<19x19x8xf32, #tpu.memory_space<vmem>>, vector<16x16x8xf32>,
    %c0_7 = arith.constant 0 : index
    %c0_8 = arith.constant 0 : index
    %c0_9 = arith.constant 0 : index
    %4 = vector.load %arg3[%c0_7, %c0_8, %c0_9] : memref<19x19x8xf32, #tpu.memory_space<vmem>>, vector<19x16x8xf32>
    %cst_10 = arith.constant 1.250000e-01 : f32
    %5 = vector.broadcast %cst_10 : f32 to vector<19x16x8xf32>
    %6 = arith.mulf %5, %4 : vector<19x16x8xf32>
    %c0_11 = arith.constant 0 : index
    %c1 = arith.constant 1 : index
    %c0_12 = arith.constant 0 : index
    %7 = vector.load %arg3[%c0_11, %c1, %c0_12] : memref<19x19x8xf32, #tpu.memory_space<vmem>>, vector<19x16x8xf32>
    %cst_13 = arith.constant 3.750000e-01 : f32
    %8 = vector.broadcast %cst_13 : f32 to vector<19x16x8xf32>
    %9 = arith.mulf %8, %7 : vector<19x16x8xf32>
    %10 = arith.addf %6, %9 : vector<19x16x8xf32>
    %c0_14 = arith.constant 0 : index
    %c2_15 = arith.constant 2 : index
    %c0_16 = arith.constant 0 : index
    %11 = vector.load %arg3[%c0_14, %c2_15, %c0_16] : memref<19x19x8xf32, #tpu.memory_space<vmem>>, vector<19x16x8xf32>
    %cst_17 = arith.constant 3.750000e-01 : f32
    %12 = vector.broadcast %cst_17 : f32 to vector<19x16x8xf32>
    %13 = arith.mulf %12, %11 : vector<19x16x8xf32>
    %14 = arith.addf %10, %13 : vector<19x16x8xf32>
    %c0_18 = arith.constant 0 : index
    %c3 = arith.constant 3 : index
    %c0_19 = arith.constant 0 : index
    %15 = vector.load %arg3[%c0_18, %c3, %c0_19] : memref<19x19x8xf32, #tpu.memory_space<vmem>>, vector<19x16x8xf32>
    %cst_20 = arith.constant 1.250000e-01 : f32
    %16 = vector.broadcast %cst_20 : f32 to vector<19x16x8xf32>
    %17 = arith.mulf %16, %15 : vector<19x16x8xf32>
    %18 = arith.addf %14, %17 : vector<19x16x8xf32>
    %19 = vector.extract_strided_slice %18 {offsets = [0, 0, 0], sizes = [16, 16, 8], strides = [1, 1, 1]} : vector<19x16x8xf32> to vector<16x16x8xf32>
    %cst_21 = arith.constant 1.250000e-01 : f32
    %20 = vector.broadcast %cst_21 : f32 to vector<16x16x8xf32>
    %21 = arith.mulf %20, %19 : vector<16x16x8xf32>
    %22 = vector.extract_strided_slice %18 {offsets = [1, 0, 0], sizes = [16, 16, 8], strides = [1, 1, 1]} : vector<19x16x8xf32> to vector<16x16x8xf32>
    %cst_22 = arith.constant 3.750000e-01 : f32
    %23 = vector.broadcast %cst_22 : f32 to vector<16x16x8xf32>
    %24 = arith.mulf %23, %22 : vector<16x16x8xf32>
    %25 = arith.addf %21, %24 : vector<16x16x8xf32>
    %26 = vector.extract_strided_slice %18 {offsets = [2, 0, 0], sizes = [16, 16, 8], strides = [1, 1, 1]} : vector<19x16x8xf32> to vector<16x16x8xf32>
    %cst_23 = arith.constant 3.750000e-01 : f32
    %27 = vector.broadcast %cst_23 : f32 to vector<16x16x8xf32>
    %28 = arith.mulf %27, %26 : vector<16x16x8xf32>
    %29 = arith.addf %25, %28 : vector<16x16x8xf32>
    %30 = vector.extract_strided_slice %18 {offsets = [3, 0, 0], sizes = [16, 16, 8], strides = [1, 1, 1]} : vector<19x16x8xf32> to vector<16x16x8xf32>
    %cst_24 = arith.constant 1.250000e-01 : f32
    %31 = vector.broadcast %cst_24 : f32 to vector<16x16x8xf32>
    %32 = arith.mulf %31, %30 : vector<16x16x8xf32>
    %33 = arith.addf %29, %32 : vector<16x16x8xf32>
    %c0_25 = arith.constant 0 : index
    %c0_26 = arith.constant 0 : index
    %c0_27 = arith.constant 0 : index
    %34 = vector.load %arg2[%c0_25, %c0_26, %c0_27] : memref<16x16x8xf32, #tpu.memory_space<vmem>>, vector<16x16x8xf32>
    tpu.vector_store %arg2[%c0_25, %c0_26, %c0_27], %33 {strides = array<i32>} : memref<16x16x8xf32, #tpu.memory_space<vmem>>, vector<16x16x8xf32>,
    return
  }
  func.func @transform_0(%arg0: i32) -> (i32, i32, i32) {
    %c0_i32 = arith.constant 0 : i32
    %c0_i32_0 = arith.constant 0 : i32
    %c0_i32_1 = arith.constant 0 : i32
    return %c0_i32, %c0_i32_0, %arg0 : i32, i32, i32
  }
  func.func @transform_1(%arg0: i32) -> (i32, i32, i32) {
    %c0_i32 = arith.constant 0 : i32
    %c0_i32_0 = arith.constant 0 : i32
    %c0_i32_1 = arith.constant 0 : i32
    return %c0_i32, %c0_i32_0, %arg0 : i32, i32, i32
  }
}

</mosaic_0001>

<bundles_post_ra>
// kernel: tpu_custom_call.1
= control target key start
LH: loop header
LB: loop body
LE: loop exit
PB: predicated region body
PF: predicated region fallthrough
CT: control target
= control target key end

     0   :  { %vm8_vm0 = vcmask 64512   ;;  %vm11_vm1 = vcmask 59392   ;;  %v755_v0 = vmov 0.0   ;;  %s1187_s0 = inlined_call_operand.vmem [shape: f32[16,16,8], index: 0, kind: input, shape index: {}]   ;;  %s1188_s1 = inlined_call_operand.vmem [shape: f32[16,16,8], index: 1, kind: output, shape index: {}]  }
   0x1   :  { %9 = vst.msk [vmem:[#allocation2] sm:$0xff] %vm8_vm0, %v755_v0  ;;  %10 = vst.msk [vmem:[#allocation2 + $0x8] sm:$0xff] %vm8_vm0, %v755_v0  ;;  %v67_v1 = vld [vmem:[%s1187_s0] sm:$0xff]  ;;  %v68_v2 = vld [vmem:[%s1187_s0 + $0x8] sm:$0xff] }
   0x2   :  { %13 = vst.msk [vmem:[#allocation2 + $0x18] sm:$0xff] %vm8_vm0, %v755_v0  ;;  %14 = vst.msk [vmem:[#allocation2 + $0x20] sm:$0xff] %vm8_vm0, %v755_v0  ;;  %v69_v3 = vld [vmem:[%s1187_s0 + $0x10] sm:$0xff]  ;;  %v70_v4 = vld [vmem:[%s1187_s0 + $0x18] sm:$0xff] }
   0x3   :  { %16 = vst.msk [vmem:[#allocation2 + $0x30] sm:$0xff] %vm8_vm0, %v755_v0  ;;  %17 = vst.msk [vmem:[#allocation2 + $0x38] sm:$0xff] %vm8_vm0, %v755_v0  ;;  %v71_v5 = vld [vmem:[%s1187_s0 + $0x20] sm:$0xff]  ;;  %v72_v6 = vld [vmem:[%s1187_s0 + $0x28] sm:$0xff] }
   0x4   :  { %19 = vst.msk [vmem:[#allocation2 + $0x48] sm:$0xff] %vm8_vm0, %v755_v0  ;;  %20 = vst.msk [vmem:[#allocation2 + $0x50] sm:$0xff] %vm8_vm0, %v755_v0  ;;  %v73_v7 = vld [vmem:[%s1187_s0 + $0x30] sm:$0xff]  ;;  %v74_v8 = vld [vmem:[%s1187_s0 + $0x38] sm:$0xff] }
   0x5   :  { %22 = vst.msk [vmem:[#allocation2 + $0x60] sm:$0xff] %vm8_vm0, %v755_v0  ;;  %23 = vst.msk [vmem:[#allocation2 + $0x68] sm:$0xff] %vm8_vm0, %v755_v0  ;;  %v75_v9 = vld [vmem:[%s1187_s0 + $0x40] sm:$0xff]  ;;  %v76_v10 = vld [vmem:[%s1187_s0 + $0x48] sm:$0xff] }
   0x6   :  { %25 = vst.msk [vmem:[#allocation2 + $0x78] sm:$0xff] %vm8_vm0, %v755_v0  ;;  %26 = vst.msk [vmem:[#allocation2 + $0x80] sm:$0xff] %vm8_vm0, %v755_v0  ;;  %v77_v11 = vld [vmem:[%s1187_s0 + $0x50] sm:$0xff]  ;;  %v78_v12 = vld [vmem:[%s1187_s0 + $0x58] sm:$0xff] }
   0x7   :  { %28 = vst.msk [vmem:[#allocation2 + $0x90] sm:$0xff] %vm8_vm0, %v755_v0  ;;  %29 = vst.msk [vmem:[#allocation2 + $0x98] sm:$0xff] %vm8_vm0, %v755_v0  ;;  %v79_v13 = vld [vmem:[%s1187_s0 + $0x60] sm:$0xff]  ;;  %v80_v14 = vld [vmem:[%s1187_s0 + $0x68] sm:$0xff] }
   0x8   :  { %31 = vst.msk [vmem:[#allocation2 + $0xa8] sm:$0xff] %vm8_vm0, %v755_v0  ;;  %32 = vst.msk [vmem:[#allocation2 + $0xb0] sm:$0xff] %vm8_vm0, %v755_v0  ;;  %v81_v15 = vld [vmem:[%s1187_s0 + $0x70] sm:$0xff]  ;;  %v82_v16 = vld [vmem:[%s1187_s0 + $0x78] sm:$0xff] }
   0x9   :  { %34 = vst.msk [vmem:[#allocation2 + $0xc0] sm:$0xff] %vm8_vm0, %v755_v0  ;;  %35 = vst.msk [vmem:[#allocation2 + $0xc8] sm:$0xff] %vm8_vm0, %v755_v0  ;;  %v83_v17 = vld [vmem:[%s1187_s0 + $0x80] sm:$0xff]  ;;  %v84_v18 = vld [vmem:[%s1187_s0 + $0x88] sm:$0xff] }
   0xa   :  { %37 = vst.msk [vmem:[#allocation2 + $0xd8] sm:$0xff] %vm8_vm0, %v755_v0  ;;  %38 = vst.msk [vmem:[#allocation2 + $0xe0] sm:$0xff] %vm8_vm0, %v755_v0  ;;  %v85_v19 = vld [vmem:[%s1187_s0 + $0x90] sm:$0xff]  ;;  %v86_v20 = vld [vmem:[%s1187_s0 + $0x98] sm:$0xff] }
   0xb   :  { %40 = vst.msk [vmem:[#allocation2 + $0xf0] sm:$0xff] %vm8_vm0, %v755_v0  ;;  %41 = vst.msk [vmem:[#allocation2 + $0xf8] sm:$0xff] %vm8_vm0, %v755_v0  ;;  %v87_v21 = vld [vmem:[%s1187_s0 + $0xa0] sm:$0xff]  ;;  %v88_v22 = vld [vmem:[%s1187_s0 + $0xa8] sm:$0xff] }
   0xc   :  { %43 = vst.msk [vmem:[#allocation2 + $0x108] sm:$0xff] %vm8_vm0, %v755_v0  ;;  %44 = vst.msk [vmem:[#allocation2 + $0x110] sm:$0xff] %vm8_vm0, %v755_v0  ;;  %v89_v23 = vld [vmem:[%s1187_s0 + $0xb0] sm:$0xff]  ;;  %v90_v24 = vld [vmem:[%s1187_s0 + $0xb8] sm:$0xff] }
   0xd   :  { %46 = vst.msk [vmem:[#allocation2 + $0x120] sm:$0xff] %vm8_vm0, %v755_v0  ;;  %47 = vst.msk [vmem:[#allocation2 + $0x128] sm:$0xff] %vm8_vm0, %v755_v0  ;;  %v91_v25 = vld [vmem:[%s1187_s0 + $0xc0] sm:$0xff]  ;;  %v92_v26 = vld [vmem:[%s1187_s0 + $0xc8] sm:$0xff] }
   0xe   :  { %49 = vst.msk [vmem:[#allocation2 + $0x138] sm:$0xff] %vm8_vm0, %v755_v0  ;;  %50 = vst.msk [vmem:[#allocation2 + $0x140] sm:$0xff] %vm8_vm0, %v755_v0  ;;  %v93_v27 = vld [vmem:[%s1187_s0 + $0xd0] sm:$0xff]  ;;  %v94_v28 = vld [vmem:[%s1187_s0 + $0xd8] sm:$0xff] }
   0xf   :  { %52 = vst.msk [vmem:[#allocation2 + $0x150] sm:$0xff] %vm8_vm0, %v755_v0  ;;  %53 = vst.msk [vmem:[#allocation2 + $0x158] sm:$0xff] %vm8_vm0, %v755_v0  ;;  %v95_v29 = vld [vmem:[%s1187_s0 + $0xe0] sm:$0xff]  ;;  %v96_v30 = vld [vmem:[%s1187_s0 + $0xe8] sm:$0xff] }
  0x10   :  { %55 = vst.msk [vmem:[#allocation2 + $0x168] sm:$0xff] %vm8_vm0, %v755_v0  ;;  %56 = vst.msk [vmem:[#allocation2 + $0x170] sm:$0xff] %vm8_vm0, %v755_v0  ;;  %v97_v31 = vld [vmem:[%s1187_s0 + $0xf0] sm:$0xff]  ;;  %v98_v32 = vld [vmem:[%s1187_s0 + $0xf8] sm:$0xff] }
  0x11   :  { %58 = vst.msk [vmem:[#allocation2 + $0x180] sm:$0xff] %vm8_vm0, %v755_v0  ;;  %59 = vst.msk [vmem:[#allocation2 + $0x188] sm:$0xff] %vm8_vm0, %v755_v0  ;;  %v132_v33 = vld [vmem:[#allocation2] sm:$0xff]  ;;  %v134_v34 = vld [vmem:[#allocation2 + $0x18] sm:$0xff] }
  0x12   :  { %61 = vst.msk [vmem:[#allocation2 + $0x198] sm:$0xff] %vm8_vm0, %v755_v0  ;;  %62 = vst.msk [vmem:[#allocation2 + $0x1a0] sm:$0xff] %vm8_vm0, %v755_v0  ;;  %v170_v37 = vmul.f32 0.125, %v132_v33  ;;  %v172_v38 = vmul.f32 0.125, %v134_v34  ;;  %v208_v41 = vld [vmem:[#allocation2 + $0x1] sm:$0xff]  ;;  %v210_v42 = vld [vmem:[#allocation2 + $0x19] sm:$0xff] }
  0x13   :  { %64 = vst.msk [vmem:[#allocation2 + $0x1b0] sm:$0xff] %vm8_vm0, %v755_v0  ;;  %65 = vst.msk [vmem:[#allocation2 + $0x1b8] sm:$0xff] %vm8_vm0, %v755_v0  ;;  %v246_v45 = vmul.f32 0.375, %v208_v41  ;;  %v248_v46 = vmul.f32 0.375, %v210_v42  ;;  %v322_v48 = vld [vmem:[#allocation2 + $0x2] sm:$0xff]  ;;  %v324_v49 = vld [vmem:[#allocation2 + $0x1a] sm:$0xff] }
  0x14   :  { %12 = vst.msk [vmem:[#allocation2 + $0x10] sm:$0x7] %vm11_vm1, %v755_v0  ;;  %15 = vst.msk [vmem:[#allocation2 + $0x28] sm:$0x7] %vm11_vm1, %v755_v0  ;;  %v360_v53 = vmul.f32 0.375, %v322_v48  ;;  %v362_v54 = vmul.f32 0.375, %v324_v49 }
  0x15   :  { %18 = vst.msk [vmem:[#allocation2 + $0x40] sm:$0x7] %vm11_vm1, %v755_v0  ;;  %21 = vst.msk [vmem:[#allocation2 + $0x58] sm:$0x7] %vm11_vm1, %v755_v0  ;;  %v436_v55 = vld [vmem:[#allocation2 + $0x3] sm:$0xff]  ;;  %v284_v56 = vadd.f32 %v246_v45, %v170_v37  ;;  %v286_v57 = vadd.f32 %v248_v46, %v172_v38  ;;  %v438_v60 = vld [vmem:[#allocation2 + $0x1b] sm:$0xff] }
  0x16   :  { %24 = vst.msk [vmem:[#allocation2 + $0x70] sm:$0x7] %vm11_vm1, %v755_v0  ;;  %27 = vst.msk [vmem:[#allocation2 + $0x88] sm:$0x7] %vm11_vm1, %v755_v0 }
  0x17   :  { %30 = vst.msk [vmem:[#allocation2 + $0xa0] sm:$0x7] %vm11_vm1, %v755_v0  ;;  %33 = vst.msk [vmem:[#allocation2 + $0xb8] sm:$0x7] %vm11_vm1, %v755_v0 }
  0x18   :  { %36 = vst.msk [vmem:[#allocation2 + $0xd0] sm:$0x7] %vm11_vm1, %v755_v0  ;;  %39 = vst.msk [vmem:[#allocation2 + $0xe8] sm:$0x7] %vm11_vm1, %v755_v0 }
  0x19   :  { %42 = vst.msk [vmem:[#allocation2 + $0x100] sm:$0x7] %vm11_vm1, %v755_v0  ;;  %45 = vst.msk [vmem:[#allocation2 + $0x118] sm:$0x7] %vm11_vm1, %v755_v0 }
  0x1a   :  { %48 = vst.msk [vmem:[#allocation2 + $0x130] sm:$0x7] %vm11_vm1, %v755_v0  ;;  %51 = vst.msk [vmem:[#allocation2 + $0x148] sm:$0x7] %vm11_vm1, %v755_v0 }
  0x1b   :  { %54 = vst.msk [vmem:[#allocation2 + $0x160] sm:$0x7] %vm11_vm1, %v755_v0  ;;  %57 = vst.msk [vmem:[#allocation2 + $0x178] sm:$0x7] %vm11_vm1, %v755_v0 }
  0x1c   :  { %60 = vst.msk [vmem:[#allocation2 + $0x190] sm:$0x7] %vm11_vm1, %v755_v0  ;;  %63 = vst.msk [vmem:[#allocation2 + $0x1a8] sm:$0x7] %vm11_vm1, %v755_v0 }
  0x1d   :  { %66 = vst.msk [vmem:[#allocation2 + $0x1c0] sm:$0x7] %vm11_vm1, %v755_v0 }
  0x1e   :  { %100 = vst.msk [vmem:[#allocation2 + $0x32] sm:$0xff] %vm8_vm0, %v67_v1  ;;  %101 = vst.msk [vmem:[#allocation2 + $0x3a] sm:$0xff] %vm8_vm0, %v68_v2  ;;  %v474_v1 = vmul.f32 0.125, %v436_v55  ;;  %v476_v2 = vmul.f32 0.125, %v438_v60 }
  0x1f   :  { %102 = vst.msk [vmem:[#allocation2 + $0x4a] sm:$0xff] %vm8_vm0, %v69_v3  ;;  %103 = vst.msk [vmem:[#allocation2 + $0x52] sm:$0xff] %vm8_vm0, %v70_v4  ;;  %v133_v3 = vld [vmem:[#allocation2 + $0x8] sm:$0xff]  ;;  %v135_v4 = vld [vmem:[#allocation2 + $0x20] sm:$0xff] }
  0x20   :  { %104 = vst.msk [vmem:[#allocation2 + $0x62] sm:$0xff] %vm8_vm0, %v71_v5  ;;  %105 = vst.msk [vmem:[#allocation2 + $0x6a] sm:$0xff] %vm8_vm0, %v72_v6  ;;  %v398_v6 = vadd.f32 %v360_v53, %v284_v56 }
  0x21   :  { %106 = vst.msk [vmem:[#allocation2 + $0x7a] sm:$0xff] %vm8_vm0, %v73_v7  ;;  %107 = vst.msk [vmem:[#allocation2 + $0x82] sm:$0xff] %vm8_vm0, %v74_v8  ;;  %v400_v7 = vadd.f32 %v362_v54, %v286_v57 }
  0x22   :  { %108 = vst.msk [vmem:[#allocation2 + $0x92] sm:$0xff] %vm8_vm0, %v75_v9  ;;  %109 = vst.msk [vmem:[#allocation2 + $0x9a] sm:$0xff] %vm8_vm0, %v76_v10 }
  0x23   :  { %110 = vst.msk [vmem:[#allocation2 + $0xaa] sm:$0xff] %vm8_vm0, %v77_v11  ;;  %111 = vst.msk [vmem:[#allocation2 + $0xb2] sm:$0xff] %vm8_vm0, %v78_v12  ;;  %v209_v11 = vld [vmem:[#allocation2 + $0x9] sm:$0xff]  ;;  %v211_v12 = vld [vmem:[#allocation2 + $0x21] sm:$0xff] }
  0x24   :  { %112 = vst.msk [vmem:[#allocation2 + $0xc2] sm:$0xff] %vm8_vm0, %v79_v13  ;;  %113 = vst.msk [vmem:[#allocation2 + $0xca] sm:$0xff] %vm8_vm0, %v80_v14 }
  0x25   :  { %114 = vst.msk [vmem:[#allocation2 + $0xda] sm:$0xff] %vm8_vm0, %v81_v15  ;;  %115 = vst.msk [vmem:[#allocation2 + $0xe2] sm:$0xff] %vm8_vm0, %v82_v16  ;;  %v136_v35 = vld [vmem:[#allocation2 + $0x30] sm:$0xff]  ;;  %v137_v5 = vld [vmem:[#allocation2 + $0x38] sm:$0xff]  ;;  %v171_v15 = vmul.f32 0.125, %v133_v3  ;;  %v173_v16 = vmul.f32 0.125, %v135_v4 }
  0x26   :  { %116 = vst.msk [vmem:[#allocation2 + $0xf2] sm:$0xff] %vm8_vm0, %v83_v17  ;;  %117 = vst.msk [vmem:[#allocation2 + $0xfa] sm:$0xff] %vm8_vm0, %v84_v18  ;;  %v138_v36 = vld [vmem:[#allocation2 + $0x48] sm:$0xff]  ;;  %v174_v39 = vmul.f32 0.125, %v136_v35  ;;  %v212_v43 = vld [vmem:[#allocation2 + $0x31] sm:$0xff]  ;;  %v512_v18 = vadd.f32 %v474_v1, %v398_v6 }
  0x27   :  { %118 = vst.msk [vmem:[#allocation2 + $0x10a] sm:$0xff] %vm8_vm0, %v85_v19  ;;  %119 = vst.msk [vmem:[#allocation2 + $0x112] sm:$0xff] %vm8_vm0, %v86_v20  ;;  %v176_v40 = vmul.f32 0.125, %v138_v36  ;;  %v214_v44 = vld [vmem:[#allocation2 + $0x49] sm:$0xff]  ;;  %v250_v47 = vmul.f32 0.375, %v212_v43  ;;  %v326_v51 = vld [vmem:[#allocation2 + $0x32] sm:$0xff]  ;;  %v514_v19 = vadd.f32 %v476_v2, %v400_v7 }
  0x28   :  { %120 = vst.msk [vmem:[#allocation2 + $0x122] sm:$0xff] %vm8_vm0, %v87_v21  ;;  %121 = vst.msk [vmem:[#allocation2 + $0x12a] sm:$0xff] %vm8_vm0, %v88_v22  ;;  %v252_v50 = vmul.f32 0.375, %v214_v44  ;;  %v328_v52 = vld [vmem:[#allocation2 + $0x4a] sm:$0xff]  ;;  %v364_v59 = vmul.f32 0.375, %v326_v51  ;;  %v440_v61 = vld [vmem:[#allocation2 + $0x33] sm:$0xff] }
  0x29   :  { %122 = vst.msk [vmem:[#allocation2 + $0x13a] sm:$0xff] %vm8_vm0, %v89_v23  ;;  %123 = vst.msk [vmem:[#allocation2 + $0x142] sm:$0xff] %vm8_vm0, %v90_v24  ;;  %v288_v58 = vadd.f32 %v250_v47, %v174_v39  ;;  %v442_v62 = vld [vmem:[#allocation2 + $0x4b] sm:$0xff]  ;;  %v366_v0 = vmul.f32 0.375, %v328_v52  ;;  %v478_v9 = vmul.f32 0.125, %v440_v61  ;;  %v213_v17 = vld [vmem:[#allocation2 + $0x39] sm:$0xff] }
  0x2a   :  { %124 = vst.msk [vmem:[#allocation2 + $0x152] sm:$0xff] %vm8_vm0, %v91_v25  ;;  %125 = vst.msk [vmem:[#allocation2 + $0x15a] sm:$0xff] %vm8_vm0, %v92_v26  ;;  %v290_v63 = vadd.f32 %v252_v50, %v176_v40  ;;  %v139_v10 = vld [vmem:[#allocation2 + $0x50] sm:$0xff]  ;;  %v480_v14 = vmul.f32 0.125, %v442_v62  ;;  %v175_v21 = vmul.f32 0.125, %v137_v5  ;;  %v247_v25 = vmul.f32 0.375, %v209_v11 }
  0x2b   :  { %126 = vst.msk [vmem:[#allocation2 + $0x16a] sm:$0xff] %vm8_vm0, %v93_v27  ;;  %127 = vst.msk [vmem:[#allocation2 + $0x172] sm:$0xff] %vm8_vm0, %v94_v28  ;;  %v402_v8 = vadd.f32 %v364_v59, %v288_v58  ;;  %v215_v22 = vld [vmem:[#allocation2 + $0x51] sm:$0xff]  ;;  %v177_v24 = vmul.f32 0.125, %v139_v10  ;;  %v249_v26 = vmul.f32 0.375, %v211_v12  ;;  %v325_v28 = vld [vmem:[#allocation2 + $0x22] sm:$0xff] }
  0x2c   :  { %128 = vst.msk [vmem:[#allocation2 + $0x182] sm:$0xff] %vm8_vm0, %v95_v29  ;;  %129 = vst.msk [vmem:[#allocation2 + $0x18a] sm:$0xff] %vm8_vm0, %v96_v30  ;;  %v404_v13 = vadd.f32 %v366_v0, %v290_v63  ;;  %v323_v27 = vld [vmem:[#allocation2 + $0xa] sm:$0xff]  ;;  %v327_v29 = vld [vmem:[#allocation2 + $0x3a] sm:$0xff]  ;;  %v550_v30 = vmul.f32 0.125, %v512_v18  ;;  %v251_v33 = vmul.f32 0.375, %v213_v17  ;;  %v285_v38 = vadd.f32 %v247_v25, %v171_v15 }
  0x2d   :  { %130 = vst.msk [vmem:[#allocation2 + $0x19a] sm:$0xff] %vm8_vm0, %v97_v31  ;;  %131 = vst.msk [vmem:[#allocation2 + $0x1a2] sm:$0xff] %vm8_vm0, %v98_v32  ;;  %v951_v20 = vadd.f32 %v478_v9, %v402_v8  ;;  %v582_v31 = vmul.f32 0.375, %v514_v19  ;;  %v329_v34 = vld [vmem:[#allocation2 + $0x52] sm:$0xff]  ;;  %v253_v37 = vmul.f32 0.375, %v215_v22  ;;  %v287_v39 = vadd.f32 %v249_v26, %v173_v16  ;;  %v439_v40 = vld [vmem:[#allocation2 + $0x23] sm:$0xff] }
  0x2e   :  { %v518_v23 = vadd.f32 %v480_v14, %v404_v13  ;;  %v437_v35 = vld [vmem:[#allocation2 + $0xb] sm:$0xff]  ;;  %v289_v42 = vadd.f32 %v251_v33, %v175_v21  ;;  %v361_v43 = vmul.f32 0.375, %v323_v27  ;;  %v363_v44 = vmul.f32 0.375, %v325_v28  ;;  %v441_v45 = vld [vmem:[#allocation2 + $0x3b] sm:$0xff]  ;;  %v443_v46 = vld [vmem:[#allocation2 + $0x53] sm:$0xff] }
  0x2f   :  { %v584_v32 = vmul.f32 0.375, %v951_v20  ;;  %v614_v41 = vadd.f32 %v582_v31, %v550_v30  ;;  %v291_v47 = vadd.f32 %v253_v37, %v177_v24  ;;  %v365_v48 = vmul.f32 0.375, %v327_v29  ;;  %v140_v51 = vld [vmem:[#allocation2 + $0x60] sm:$0xff]  ;;  %v141_v7 = vld [vmem:[#allocation2 + $0x68] sm:$0xff]  ;;  %v142_v26 = vld [vmem:[#allocation2 + $0x78] sm:$0xff] }
  0x30   :  { %v954_v36 = vmul.f32 0.125, %v518_v23  ;;  %v367_v49 = vmul.f32 0.375, %v329_v34  ;;  %v475_v50 = vmul.f32 0.125, %v437_v35  ;;  %v399_v53 = vadd.f32 %v361_v43, %v285_v38  ;;  %v216_v56 = vld [vmem:[#allocation2 + $0x61] sm:$0xff]  ;;  %v217_v8 = vld [vmem:[#allocation2 + $0x69] sm:$0xff]  ;;  %v218_v27 = vld [vmem:[#allocation2 + $0x79] sm:$0xff] }
  0x31   :  { %v648_v52 = vadd.f32 %v614_v41, %v584_v32  ;;  %v401_v54 = vadd.f32 %v363_v44, %v287_v39  ;;  %v477_v55 = vmul.f32 0.125, %v439_v40  ;;  %v330_v57 = vld [vmem:[#allocation2 + $0x62] sm:$0xff]  ;;  %v403_v58 = vadd.f32 %v365_v48, %v289_v42  ;;  %v331_v13 = vld [vmem:[#allocation2 + $0x6a] sm:$0xff]  ;;  %v332_v33 = vld [vmem:[#allocation2 + $0x7a] sm:$0xff] }
  0x32   :  { %v405_v59 = vadd.f32 %v367_v49, %v291_v47  ;;  %v479_v60 = vmul.f32 0.125, %v441_v45  ;;  %v481_v61 = vmul.f32 0.125, %v443_v46  ;;  %v444_v62 = vld [vmem:[#allocation2 + $0x63] sm:$0xff]  ;;  %v513_v0 = vadd.f32 %v475_v50, %v399_v53  ;;  %v445_v14 = vld [vmem:[#allocation2 + $0x6b] sm:$0xff]  ;;  %v446_v34 = vld [vmem:[#allocation2 + $0x7b] sm:$0xff] }
  0x33   :  { %v686_v63 = vadd.f32 %v648_v52, %v954_v36  ;;  %v515_v1 = vadd.f32 %v477_v55, %v401_v54  ;;  %v178_v2 = vmul.f32 0.125, %v140_v51  ;;  %v254_v5 = vmul.f32 0.375, %v216_v56  ;;  %v143_v42 = vld [vmem:[#allocation2 + $0x80] sm:$0xff] }
  0x34   :  { %v517_v3 = vadd.f32 %v479_v60, %v403_v58  ;;  %v519_v4 = vadd.f32 %v481_v61, %v405_v59  ;;  %v368_v6 = vmul.f32 0.375, %v330_v57  ;;  %v551_v9 = vmul.f32 0.125, %v513_v0  ;;  %v333_v47 = vld [vmem:[#allocation2 + $0x82] sm:$0xff]  ;;  %v144_v57 = vld [vmem:[#allocation2 + $0x90] sm:$0xff] }
  0x35   :  { %718 = vst.msk [vmem:[%s1188_s1] sm:$0xff] %vm8_vm0, %v686_v63  ;;  %v583_v10 = vmul.f32 0.375, %v515_v1  ;;  %v482_v11 = vmul.f32 0.125, %v444_v62  ;;  %v552_v12 = vmul.f32 0.125, %v514_v19  ;;  %v292_v17 = vadd.f32 %v254_v5, %v178_v2  ;;  %v447_v52 = vld [vmem:[#allocation2 + $0x83] sm:$0xff]  ;;  %v220_v62 = vld [vmem:[#allocation2 + $0x91] sm:$0xff] }
  0x36   :  { %v961_v15 = vmul.f32 0.125, %v519_v4  ;;  %v585_v16 = vmul.f32 0.375, %v517_v3  ;;  %v586_v18 = vmul.f32 0.375, %v518_v23  ;;  %v179_v24 = vmul.f32 0.125, %v141_v7  ;;  %v334_v2 = vld [vmem:[#allocation2 + $0x92] sm:$0xff] }
  0x37   :  { %v615_v21 = vadd.f32 %v583_v10, %v551_v9  ;;  %v616_v22 = vadd.f32 %v584_v32, %v552_v12  ;;  %v255_v25 = vmul.f32 0.375, %v217_v8  ;;  %v406_v28 = vadd.f32 %v368_v6, %v292_v17  ;;  %v219_v32 = vld [vmem:[#allocation2 + $0x81] sm:$0xff]  ;;  %v448_v12 = vld [vmem:[#allocation2 + $0x93] sm:$0xff] }
  0x38   :  { %v369_v29 = vmul.f32 0.375, %v331_v13  ;;  %v483_v30 = vmul.f32 0.125, %v445_v14  ;;  %v553_v31 = vmul.f32 0.125, %v515_v1  ;;  %v587_v38 = vmul.f32 0.375, %v519_v4  ;;  %v145_v13 = vld [vmem:[#allocation2 + $0x98] sm:$0xff] }
  0x39   :  { %v649_v19 = vadd.f32 %v615_v21, %v585_v16  ;;  %v650_v35 = vadd.f32 %v616_v22, %v586_v18  ;;  %v293_v37 = vadd.f32 %v255_v25, %v179_v24  ;;  %v520_v39 = vadd.f32 %v482_v11, %v406_v28  ;;  %v221_v14 = vld [vmem:[#allocation2 + $0x99] sm:$0xff]  ;;  %v146_v25 = vld [vmem:[#allocation2 + $0xa8] sm:$0xff] }
  0x3a   :  { %v617_v40 = vadd.f32 %v585_v16, %v553_v31  ;;  %v180_v41 = vmul.f32 0.125, %v142_v26  ;;  %v256_v23 = vmul.f32 0.375, %v218_v27  ;;  %v370_v45 = vmul.f32 0.375, %v332_v33  ;;  %v335_v17 = vld [vmem:[#allocation2 + $0x9a] sm:$0xff] }
  0x3b   :  { %v687_v43 = vadd.f32 %v649_v19, %v961_v15  ;;  %v407_v44 = vadd.f32 %v369_v29, %v293_v37  ;;  %v484_v46 = vmul.f32 0.125, %v446_v34  ;;  %v964_v48 = vmul.f32 0.125, %v520_v39  ;;  %v336_v37 = vld [vmem:[#allocation2 + $0xaa] sm:$0xff] }
  0x3c   :  { %v651_v49 = vadd.f32 %v617_v40, %v587_v38  ;;  %v294_v50 = vadd.f32 %v256_v23, %v180_v41  ;;  %v554_v51 = vmul.f32 0.125, %v951_v20  ;;  %v588_v54 = vmul.f32 0.375, %v520_v39  ;;  %v147_v41 = vld [vmem:[#allocation2 + $0xb0] sm:$0xff] }
  0x3d   :  { %719 = vst.msk [vmem:[%s1188_s1 + $0x8] sm:$0xff] %vm8_vm0, %v687_v43  ;;  %v521_v53 = vadd.f32 %v483_v30, %v407_v44  ;;  %v181_v55 = vmul.f32 0.125, %v143_v42  ;;  %v257_v56 = vmul.f32 0.375, %v219_v32  ;;  %v688_v58 = vadd.f32 %v650_v35, %v964_v48  ;;  %v222_v30 = vld [vmem:[#allocation2 + $0xa9] sm:$0xff]  ;;  %v449_v35 = vld [vmem:[#allocation2 + $0x9b] sm:$0xff] }
  0x3e   :  { %v408_v59 = vadd.f32 %v370_v45, %v294_v50  ;;  %v618_v60 = vadd.f32 %v586_v18, %v554_v51  ;;  %v371_v61 = vmul.f32 0.375, %v333_v47  ;;  %v485_v0 = vmul.f32 0.125, %v447_v52  ;;  %v450_v44 = vld [vmem:[#allocation2 + $0xab] sm:$0xff]  ;;  %v451_v52 = vld [vmem:[#allocation2 + $0xb3] sm:$0xff] }
  0x3f   :  { %v972_v63 = vmul.f32 0.125, %v521_v53  ;;  %v295_v20 = vadd.f32 %v257_v56, %v181_v55  ;;  %v555_v1 = vmul.f32 0.125, %v517_v3  ;;  %720 = vst.msk [vmem:[%s1188_s1 + $0x10] sm:$0xff] %vm8_vm0, %v688_v58  ;;  %v589_v6 = vmul.f32 0.375, %v521_v53  ;;  %v223_v45 = vld [vmem:[#allocation2 + $0xb1] sm:$0xff]  ;;  %v148_v56 = vld [vmem:[#allocation2 + $0xc0] sm:$0xff] }
  0x40   :  { %v522_v4 = vadd.f32 %v484_v46, %v408_v59  ;;  %v652_v5 = vadd.f32 %v618_v60, %v588_v54  ;;  %v182_v7 = vmul.f32 0.125, %v144_v57  ;;  %v258_v11 = vmul.f32 0.375, %v220_v62  ;;  %v337_v51 = vld [vmem:[#allocation2 + $0xb2] sm:$0xff] }
  0x41   :  { %v689_v8 = vadd.f32 %v651_v49, %v972_v63  ;;  %v409_v9 = vadd.f32 %v371_v61, %v295_v20  ;;  %v619_v10 = vadd.f32 %v587_v38, %v555_v1  ;;  %v372_v3 = vmul.f32 0.375, %v334_v2  ;;  %v224_v61 = vld [vmem:[#allocation2 + $0xc1] sm:$0xff] }
  0x42   :  { %v979_v16 = vmul.f32 0.125, %v522_v4  ;;  %v296_v22 = vadd.f32 %v258_v11, %v182_v7  ;;  %v620_v24 = vadd.f32 %v588_v54, %v954_v36  ;;  %v486_v27 = vmul.f32 0.125, %v448_v12  ;;  %v338_v2 = vld [vmem:[#allocation2 + $0xc2] sm:$0xff] }
  0x43   :  { %721 = vst.msk [vmem:[%s1188_s1 + $0x18] sm:$0xff] %vm8_vm0, %v689_v8  ;;  %v523_v18 = vadd.f32 %v485_v0, %v409_v9  ;;  %v653_v21 = vadd.f32 %v619_v10, %v589_v6  ;;  %v183_v28 = vmul.f32 0.125, %v145_v13  ;;  %v259_v29 = vmul.f32 0.375, %v221_v14  ;;  %v149_v8 = vld [vmem:[#allocation2 + $0xc8] sm:$0xff] }
  0x44   :  { %v690_v26 = vadd.f32 %v652_v5, %v979_v16  ;;  %v410_v33 = vadd.f32 %v372_v3, %v296_v22  ;;  %v590_v34 = vmul.f32 0.375, %v522_v4  ;;  %v373_v19 = vmul.f32 0.375, %v335_v17  ;;  %v452_v4 = vld [vmem:[#allocation2 + $0xc3] sm:$0xff]  ;;  %v453_v22 = vld [vmem:[#allocation2 + $0xcb] sm:$0xff] }
  0x45   :  { %v987_v31 = vmul.f32 0.125, %v523_v18  ;;  %v297_v36 = vadd.f32 %v259_v29, %v183_v28  ;;  %v591_v38 = vmul.f32 0.375, %v523_v18  ;;  %v621_v39 = vadd.f32 %v589_v6, %v961_v15  ;;  %v225_v13 = vld [vmem:[#allocation2 + $0xc9] sm:$0xff] }
  0x46   :  { %722 = vst.msk [vmem:[%s1188_s1 + $0x20] sm:$0xff] %vm8_vm0, %v690_v26  ;;  %v184_v40 = vmul.f32 0.125, %v146_v25  ;;  %v524_v42 = vadd.f32 %v486_v27, %v410_v33  ;;  %v654_v32 = vadd.f32 %v620_v24, %v590_v34  ;;  %v260_v43 = vmul.f32 0.375, %v222_v30  ;;  %v150_v27 = vld [vmem:[#allocation2 + $0xd8] sm:$0xff] }
  0x47   :  { %v691_v23 = vadd.f32 %v653_v21, %v987_v31  ;;  %v411_v46 = vadd.f32 %v373_v19, %v297_v36  ;;  %v487_v47 = vmul.f32 0.125, %v449_v35  ;;  %v655_v49 = vadd.f32 %v621_v39, %v591_v38  ;;  %v339_v21 = vld [vmem:[#allocation2 + $0xca] sm:$0xff]  ;;  %v454_v39 = vld [vmem:[#allocation2 + $0xdb] sm:$0xff] }
  0x48   :  { %v374_v50 = vmul.f32 0.375, %v336_v37  ;;  %v999_v15 = vmul.f32 0.125, %v524_v42  ;;  %v298_v53 = vadd.f32 %v260_v43, %v184_v40  ;;  %v622_v54 = vadd.f32 %v590_v34, %v964_v48  ;;  %v226_v34 = vld [vmem:[#allocation2 + $0xd9] sm:$0xff] }
  0x49   :  { %723 = vst.msk [vmem:[%s1188_s1 + $0x28] sm:$0xff] %vm8_vm0, %v691_v23  ;;  %v185_v55 = vmul.f32 0.125, %v147_v41  ;;  %v525_v57 = vadd.f32 %v487_v47, %v411_v46  ;;  %v488_v58 = vmul.f32 0.125, %v450_v44  ;;  %v592_v59 = vmul.f32 0.375, %v524_v42  ;;  %v151_v42 = vld [vmem:[#allocation2 + $0xe0] sm:$0xff] }
  0x4a   :  { %v261_v60 = vmul.f32 0.375, %v223_v45  ;;  %v692_v62 = vadd.f32 %v654_v32, %v999_v15  ;;  %v412_v20 = vadd.f32 %v374_v50, %v298_v53  ;;  %v375_v0 = vmul.f32 0.375, %v337_v51  ;;  %v227_v46 = vld [vmem:[#allocation2 + $0xe1] sm:$0xff] }
  0x4b   :  { %v489_v1 = vmul.f32 0.125, %v451_v52  ;;  %v1003_v5 = vmul.f32 0.125, %v525_v57  ;;  %v623_v7 = vadd.f32 %v591_v38, %v972_v63  ;;  %v186_v48 = vmul.f32 0.125, %v148_v56  ;;  %v340_v38 = vld [vmem:[#allocation2 + $0xda] sm:$0xff]  ;;  %v341_v52 = vld [vmem:[#allocation2 + $0xe2] sm:$0xff] }
  0x4c   :  { %v299_v6 = vadd.f32 %v261_v60, %v185_v55  ;;  %724 = vst.msk [vmem:[%s1188_s1 + $0x30] sm:$0xff] %vm8_vm0, %v692_v62  ;;  %v526_v9 = vadd.f32 %v488_v58, %v412_v20  ;;  %v656_v10 = vadd.f32 %v622_v54, %v592_v59  ;;  %v593_v11 = vmul.f32 0.375, %v525_v57  ;;  %v455_v53 = vld [vmem:[#allocation2 + $0xe3] sm:$0xff]  ;;  %v152_v57 = vld [vmem:[#allocation2 + $0xf0] sm:$0xff] }
  0x4d   :  { %v262_v12 = vmul.f32 0.375, %v224_v61  ;;  %v693_v14 = vadd.f32 %v655_v49, %v1003_v5  ;;  %v376_v17 = vmul.f32 0.375, %v338_v2  ;;  %v490_v18 = vmul.f32 0.125, %v452_v4  ;;  %v228_v62 = vld [vmem:[#allocation2 + $0xf1] sm:$0xff] }
  0x4e   :  { %v413_v3 = vadd.f32 %v375_v0, %v299_v6  ;;  %v1011_v63 = vmul.f32 0.125, %v526_v9  ;;  %v624_v25 = vadd.f32 %v592_v59, %v979_v16  ;;  %v187_v26 = vmul.f32 0.125, %v149_v8  ;;  %v342_v4 = vld [vmem:[#allocation2 + $0xf2] sm:$0xff] }
  0x4f   :  { %v300_v24 = vadd.f32 %v262_v12, %v186_v48  ;;  %725 = vst.msk [vmem:[%s1188_s1 + $0x38] sm:$0xff] %vm8_vm0, %v693_v14  ;;  %v657_v29 = vadd.f32 %v623_v7, %v593_v11  ;;  %v594_v30 = vmul.f32 0.375, %v526_v9  ;;  %v263_v33 = vmul.f32 0.375, %v225_v13  ;;  %v456_v6 = vld [vmem:[#allocation2 + $0xf3] sm:$0xff] }
  0x50   :  { %v527_v28 = vadd.f32 %v489_v1, %v413_v3  ;;  %v694_v19 = vadd.f32 %v656_v10, %v1011_v63  ;;  %v377_v37 = vmul.f32 0.375, %v339_v21  ;;  %v491_v36 = vmul.f32 0.125, %v453_v22  ;;  %v153_v9 = vld [vmem:[#allocation2 + $0xf8] sm:$0xff] }
  0x51   :  { %v414_v35 = vadd.f32 %v376_v17, %v300_v24  ;;  %v301_v40 = vadd.f32 %v263_v33, %v187_v26  ;;  %v625_v41 = vadd.f32 %v593_v11, %v987_v31  ;;  %v188_v23 = vmul.f32 0.125, %v150_v27  ;;  %v229_v14 = vld [vmem:[#allocation2 + $0xf9] sm:$0xff] }
  0x52   :  { %v1019_v16 = vmul.f32 0.125, %v527_v28  ;;  %726 = vst.msk [vmem:[%s1188_s1 + $0x40] sm:$0xff] %vm8_vm0, %v694_v19  ;;  %v658_v43 = vadd.f32 %v624_v25, %v594_v30  ;;  %v595_v44 = vmul.f32 0.375, %v527_v28  ;;  %v264_v45 = vmul.f32 0.375, %v226_v34  ;;  %v343_v22 = vld [vmem:[#allocation2 + $0xfa] sm:$0xff]  ;;  %v154_v28 = vld [vmem:[#allocation2 + $0x108] sm:$0xff] }
  0x53   :  { %v528_v32 = vadd.f32 %v490_v18, %v414_v35  ;;  %v415_v49 = vadd.f32 %v377_v37, %v301_v40  ;;  %v378_v50 = vmul.f32 0.375, %v340_v38  ;;  %v492_v51 = vmul.f32 0.125, %v454_v39  ;;  %v457_v24 = vld [vmem:[#allocation2 + $0xfb] sm:$0xff]  ;;  %v230_v19 = vld [vmem:[#allocation2 + $0x109] sm:$0xff] }
  0x54   :  { %v695_v47 = vadd.f32 %v657_v29, %v1019_v16  ;;  %v302_v54 = vadd.f32 %v264_v45, %v188_v23  ;;  %v626_v55 = vadd.f32 %v594_v30, %v999_v15  ;;  %v189_v56 = vmul.f32 0.125, %v151_v42  ;;  %v344_v39 = vld [vmem:[#allocation2 + $0x10a] sm:$0xff] }
  0x55   :  { %v1027_v31 = vmul.f32 0.125, %v528_v32  ;;  %v529_v58 = vadd.f32 %v491_v36, %v415_v49  ;;  %v659_v59 = vadd.f32 %v625_v41, %v595_v44  ;;  %v596_v60 = vmul.f32 0.375, %v528_v32  ;;  %v458_v40 = vld [vmem:[#allocation2 + $0x10b] sm:$0xff] }
  0x56   :  { %727 = vst.msk [vmem:[%s1188_s1 + $0x48] sm:$0xff] %vm8_vm0, %v695_v47  ;;  %v265_v61 = vmul.f32 0.375, %v227_v46  ;;  %v416_v0 = vadd.f32 %v378_v50, %v302_v54  ;;  %v379_v1 = vmul.f32 0.375, %v341_v52  ;;  %v493_v2 = vmul.f32 0.125, %v455_v53  ;;  %v155_v32 = vld [vmem:[#allocation2 + $0x110] sm:$0xff] }
  0x57   :  { %v696_v20 = vadd.f32 %v658_v43, %v1027_v31  ;;  %v1035_v15 = vmul.f32 0.125, %v529_v58  ;;  %v627_v48 = vadd.f32 %v595_v44, %v1003_v5  ;;  %v190_v8 = vmul.f32 0.125, %v152_v57  ;;  %v231_v47 = vld [vmem:[#allocation2 + $0x111] sm:$0xff] }
  0x58   :  { %v303_v7 = vadd.f32 %v265_v61, %v189_v56  ;;  %v530_v10 = vadd.f32 %v492_v51, %v416_v0  ;;  %v660_v11 = vadd.f32 %v626_v55, %v596_v60  ;;  %v597_v12 = vmul.f32 0.375, %v529_v58  ;;  %v345_v53 = vld [vmem:[#allocation2 + $0x112] sm:$0xff]  ;;  %v156_v58 = vld [vmem:[#allocation2 + $0x120] sm:$0xff] }
  0x59   :  { %728 = vst.msk [vmem:[%s1188_s1 + $0x50] sm:$0xff] %vm8_vm0, %v696_v20  ;;  %v266_v13 = vmul.f32 0.375, %v228_v62  ;;  %v697_v3 = vadd.f32 %v659_v59, %v1035_v15  ;;  %v380_v18 = vmul.f32 0.375, %v342_v4  ;;  %v494_v21 = vmul.f32 0.125, %v456_v6  ;;  %v459_v54 = vld [vmem:[#allocation2 + $0x113] sm:$0xff]  ;;  %v232_v20 = vld [vmem:[#allocation2 + $0x121] sm:$0xff] }
  0x5a   :  { %v417_v17 = vadd.f32 %v379_v1, %v303_v7  ;;  %v1043_v5 = vmul.f32 0.125, %v530_v10  ;;  %v628_v26 = vadd.f32 %v596_v60, %v1011_v63  ;;  %v191_v27 = vmul.f32 0.125, %v153_v9  ;;  %v346_v6 = vld [vmem:[#allocation2 + $0x122] sm:$0xff] }
  0x5b   :  { %v304_v25 = vadd.f32 %v266_v13, %v190_v8  ;;  %729 = vst.msk [vmem:[%s1188_s1 + $0x58] sm:$0xff] %vm8_vm0, %v697_v3  ;;  %v661_v30 = vadd.f32 %v627_v48, %v597_v12  ;;  %v598_v33 = vmul.f32 0.375, %v530_v10  ;;  %v267_v34 = vmul.f32 0.375, %v229_v14  ;;  %v460_v7 = vld [vmem:[#allocation2 + $0x123] sm:$0xff] }
  0x5c   :  { %v531_v29 = vadd.f32 %v493_v2, %v417_v17  ;;  %v698_v35 = vadd.f32 %v660_v11, %v1043_v5  ;;  %v381_v36 = vmul.f32 0.375, %v343_v22  ;;  %v495_v38 = vmul.f32 0.125, %v457_v24  ;;  %v157_v10 = vld [vmem:[#allocation2 + $0x128] sm:$0xff] }
  0x5d   :  { %v418_v37 = vadd.f32 %v380_v18, %v304_v25  ;;  %v305_v41 = vadd.f32 %v267_v34, %v191_v27  ;;  %v629_v23 = vadd.f32 %v597_v12, %v1019_v16  ;;  %v192_v42 = vmul.f32 0.125, %v154_v28  ;;  %v233_v3 = vld [vmem:[#allocation2 + $0x129] sm:$0xff] }
  0x5e   :  { %v1051_v63 = vmul.f32 0.125, %v531_v29  ;;  %730 = vst.msk [vmem:[%s1188_s1 + $0x60] sm:$0xff] %vm8_vm0, %v698_v35  ;;  %v662_v44 = vadd.f32 %v628_v26, %v598_v33  ;;  %v599_v45 = vmul.f32 0.375, %v531_v29  ;;  %v268_v46 = vmul.f32 0.375, %v230_v19  ;;  %v347_v24 = vld [vmem:[#allocation2 + $0x12a] sm:$0xff]  ;;  %v158_v29 = vld [vmem:[#allocation2 + $0x138] sm:$0xff] }
  0x5f   :  { %v532_v43 = vadd.f32 %v494_v21, %v418_v37  ;;  %v419_v50 = vadd.f32 %v381_v36, %v305_v41  ;;  %v382_v51 = vmul.f32 0.375, %v344_v39  ;;  %v496_v52 = vmul.f32 0.125, %v458_v40  ;;  %v461_v25 = vld [vmem:[#allocation2 + $0x12b] sm:$0xff]  ;;  %v234_v35 = vld [vmem:[#allocation2 + $0x139] sm:$0xff] }
  0x60   :  { %v699_v49 = vadd.f32 %v661_v30, %v1051_v63  ;;  %v306_v55 = vadd.f32 %v268_v46, %v192_v42  ;;  %v630_v56 = vadd.f32 %v598_v33, %v1027_v31  ;;  %v193_v57 = vmul.f32 0.125, %v155_v32  ;;  %v348_v40 = vld [vmem:[#allocation2 + $0x13a] sm:$0xff] }
  0x61   :  { %v1059_v16 = vmul.f32 0.125, %v532_v43  ;;  %v533_v59 = vadd.f32 %v495_v38, %v419_v50  ;;  %v663_v60 = vadd.f32 %v629_v23, %v599_v45  ;;  %v600_v61 = vmul.f32 0.375, %v532_v43  ;;  %v462_v41 = vld [vmem:[#allocation2 + $0x13b] sm:$0xff] }
  0x62   :  { %731 = vst.msk [vmem:[%s1188_s1 + $0x68] sm:$0xff] %vm8_vm0, %v699_v49  ;;  %v269_v62 = vmul.f32 0.375, %v231_v47  ;;  %v420_v1 = vadd.f32 %v382_v51, %v306_v55  ;;  %v383_v2 = vmul.f32 0.375, %v345_v53  ;;  %v497_v4 = vmul.f32 0.125, %v459_v54  ;;  %v159_v43 = vld [vmem:[#allocation2 + $0x140] sm:$0xff] }
  0x63   :  { %v700_v0 = vadd.f32 %v662_v44, %v1059_v16  ;;  %v1067_v31 = vmul.f32 0.125, %v533_v59  ;;  %v631_v8 = vadd.f32 %v599_v45, %v1035_v15  ;;  %v194_v9 = vmul.f32 0.125, %v156_v58  ;;  %v235_v49 = vld [vmem:[#allocation2 + $0x141] sm:$0xff] }
  0x64   :  { %v307_v48 = vadd.f32 %v269_v62, %v193_v57  ;;  %v534_v11 = vadd.f32 %v496_v52, %v420_v1  ;;  %v664_v12 = vadd.f32 %v630_v56, %v600_v61  ;;  %v601_v13 = vmul.f32 0.375, %v533_v59  ;;  %v349_v54 = vld [vmem:[#allocation2 + $0x142] sm:$0xff]  ;;  %v160_v59 = vld [vmem:[#allocation2 + $0x150] sm:$0xff] }
  0x65   :  { %732 = vst.msk [vmem:[%s1188_s1 + $0x70] sm:$0xff] %vm8_vm0, %v700_v0  ;;  %v270_v14 = vmul.f32 0.375, %v232_v20  ;;  %v701_v17 = vadd.f32 %v663_v60, %v1067_v31  ;;  %v384_v21 = vmul.f32 0.375, %v346_v6  ;;  %v498_v22 = vmul.f32 0.125, %v460_v7  ;;  %v463_v55 = vld [vmem:[#allocation2 + $0x143] sm:$0xff]  ;;  %v236_v0 = vld [vmem:[#allocation2 + $0x151] sm:$0xff] }
  0x66   :  { %v421_v18 = vadd.f32 %v383_v2, %v307_v48  ;;  %v1075_v15 = vmul.f32 0.125, %v534_v11  ;;  %v632_v27 = vadd.f32 %v600_v61, %v1043_v5  ;;  %v195_v28 = vmul.f32 0.125, %v157_v10  ;;  %v350_v7 = vld [vmem:[#allocation2 + $0x152] sm:$0xff] }
  0x67   :  { %v308_v26 = vadd.f32 %v270_v14, %v194_v9  ;;  %733 = vst.msk [vmem:[%s1188_s1 + $0x78] sm:$0xff] %vm8_vm0, %v701_v17  ;;  %v665_v33 = vadd.f32 %v631_v8, %v601_v13  ;;  %v602_v34 = vmul.f32 0.375, %v534_v11  ;;  %v271_v19 = vmul.f32 0.375, %v233_v3  ;;  %v464_v48 = vld [vmem:[#allocation2 + $0x153] sm:$0xff] }
  0x68   :  { %v535_v30 = vadd.f32 %v497_v4, %v421_v18  ;;  %v702_v37 = vadd.f32 %v664_v12, %v1075_v15  ;;  %v385_v38 = vmul.f32 0.375, %v347_v24  ;;  %v499_v39 = vmul.f32 0.125, %v461_v25  ;;  %v161_v11 = vld [vmem:[#allocation2 + $0x158] sm:$0xff] }
  0x69   :  { %v422_v36 = vadd.f32 %v384_v21, %v308_v26  ;;  %v309_v23 = vadd.f32 %v271_v19, %v195_v28  ;;  %v633_v42 = vadd.f32 %v601_v13, %v1051_v63  ;;  %v196_v32 = vmul.f32 0.125, %v158_v29  ;;  %v237_v17 = vld [vmem:[#allocation2 + $0x159] sm:$0xff] }
  0x6a   :  { %v1083_v5 = vmul.f32 0.125, %v535_v30  ;;  %734 = vst.msk [vmem:[%s1188_s1 + $0x80] sm:$0xff] %vm8_vm0, %v702_v37  ;;  %v666_v45 = vadd.f32 %v632_v27, %v602_v34  ;;  %v603_v46 = vmul.f32 0.375, %v535_v30  ;;  %v272_v47 = vmul.f32 0.375, %v234_v35  ;;  %v351_v25 = vld [vmem:[#allocation2 + $0x15a] sm:$0xff]  ;;  %v162_v30 = vld [vmem:[#allocation2 + $0x168] sm:$0xff] }
  0x6b   :  { %v536_v44 = vadd.f32 %v498_v22, %v422_v36  ;;  %v423_v51 = vadd.f32 %v385_v38, %v309_v23  ;;  %v386_v52 = vmul.f32 0.375, %v348_v40  ;;  %v500_v53 = vmul.f32 0.125, %v462_v41  ;;  %v465_v26 = vld [vmem:[#allocation2 + $0x15b] sm:$0xff]  ;;  %v238_v37 = vld [vmem:[#allocation2 + $0x169] sm:$0xff] }
  0x6c   :  { %v703_v50 = vadd.f32 %v665_v33, %v1083_v5  ;;  %v310_v56 = vadd.f32 %v272_v47, %v196_v32  ;;  %v634_v57 = vadd.f32 %v602_v34, %v1059_v16  ;;  %v197_v58 = vmul.f32 0.125, %v159_v43  ;;  %v352_v41 = vld [vmem:[#allocation2 + $0x16a] sm:$0xff] }
  0x6d   :  { %v1091_v63 = vmul.f32 0.125, %v536_v44  ;;  %v537_v60 = vadd.f32 %v499_v39, %v423_v51  ;;  %v667_v61 = vadd.f32 %v633_v42, %v603_v46  ;;  %v604_v62 = vmul.f32 0.375, %v536_v44  ;;  %v466_v23 = vld [vmem:[#allocation2 + $0x16b] sm:$0xff] }
  0x6e   :  { %735 = vst.msk [vmem:[%s1188_s1 + $0x88] sm:$0xff] %vm8_vm0, %v703_v50  ;;  %v273_v20 = vmul.f32 0.375, %v235_v49  ;;  %v424_v2 = vadd.f32 %v386_v52, %v310_v56  ;;  %v387_v4 = vmul.f32 0.375, %v349_v54  ;;  %v501_v6 = vmul.f32 0.125, %v463_v55  ;;  %v163_v44 = vld [vmem:[#allocation2 + $0x170] sm:$0xff] }
  0x6f   :  { %v704_v1 = vadd.f32 %v666_v45, %v1091_v63  ;;  %v1099_v16 = vmul.f32 0.125, %v537_v60  ;;  %v635_v9 = vadd.f32 %v603_v46, %v1067_v31  ;;  %v198_v10 = vmul.f32 0.125, %v160_v59  ;;  %v239_v50 = vld [vmem:[#allocation2 + $0x171] sm:$0xff] }
  0x70   :  { %v311_v8 = vadd.f32 %v273_v20, %v197_v58  ;;  %v538_v12 = vadd.f32 %v500_v53, %v424_v2  ;;  %v668_v13 = vadd.f32 %v634_v57, %v604_v62  ;;  %v605_v14 = vmul.f32 0.375, %v537_v60  ;;  %v353_v55 = vld [vmem:[#allocation2 + $0x172] sm:$0xff]  ;;  %v164_v60 = vld [vmem:[#allocation2 + $0x180] sm:$0xff] }
  0x71   :  { %736 = vst.msk [vmem:[%s1188_s1 + $0x90] sm:$0xff] %vm8_vm0, %v704_v1  ;;  %v274_v3 = vmul.f32 0.375, %v236_v0  ;;  %v705_v18 = vadd.f32 %v667_v61, %v1099_v16  ;;  %v388_v22 = vmul.f32 0.375, %v350_v7  ;;  %v502_v24 = vmul.f32 0.125, %v464_v48  ;;  %v467_v56 = vld [vmem:[#allocation2 + $0x173] sm:$0xff]  ;;  %v240_v1 = vld [vmem:[#allocation2 + $0x181] sm:$0xff] }
  0x72   :  { %v425_v21 = vadd.f32 %v387_v4, %v311_v8  ;;  %v1107_v31 = vmul.f32 0.125, %v538_v12  ;;  %v636_v28 = vadd.f32 %v604_v62, %v1075_v15  ;;  %v199_v29 = vmul.f32 0.125, %v161_v11  ;;  %v354_v48 = vld [vmem:[#allocation2 + $0x182] sm:$0xff] }
  0x73   :  { %v312_v27 = vadd.f32 %v274_v3, %v198_v10  ;;  %737 = vst.msk [vmem:[%s1188_s1 + $0x98] sm:$0xff] %vm8_vm0, %v705_v18  ;;  %v669_v34 = vadd.f32 %v635_v9, %v605_v14  ;;  %v606_v19 = vmul.f32 0.375, %v538_v12  ;;  %v275_v35 = vmul.f32 0.375, %v237_v17  ;;  %v468_v8 = vld [vmem:[#allocation2 + $0x183] sm:$0xff] }
  0x74   :  { %v539_v33 = vadd.f32 %v501_v6, %v425_v21  ;;  %v706_v36 = vadd.f32 %v668_v13, %v1107_v31  ;;  %v389_v39 = vmul.f32 0.375, %v351_v25  ;;  %v503_v40 = vmul.f32 0.125, %v465_v26  ;;  %v165_v12 = vld [vmem:[#allocation2 + $0x188] sm:$0xff] }
  0x75   :  { %v426_v38 = vadd.f32 %v388_v22, %v312_v27  ;;  %v313_v42 = vadd.f32 %v275_v35, %v199_v29  ;;  %v637_v32 = vadd.f32 %v605_v14, %v1083_v5  ;;  %v200_v43 = vmul.f32 0.125, %v162_v30  ;;  %v241_v18 = vld [vmem:[#allocation2 + $0x189] sm:$0xff] }
  0x76   :  { %v1115_v15 = vmul.f32 0.125, %v539_v33  ;;  %738 = vst.msk [vmem:[%s1188_s1 + $0xa0] sm:$0xff] %vm8_vm0, %v706_v36  ;;  %v670_v46 = vadd.f32 %v636_v28, %v606_v19  ;;  %v607_v47 = vmul.f32 0.375, %v539_v33  ;;  %v276_v49 = vmul.f32 0.375, %v238_v37  ;;  %v355_v26 = vld [vmem:[#allocation2 + $0x18a] sm:$0xff]  ;;  %v166_v33 = vld [vmem:[#allocation2 + $0x198] sm:$0xff] }
  0x77   :  { %v540_v45 = vadd.f32 %v502_v24, %v426_v38  ;;  %v427_v52 = vadd.f32 %v389_v39, %v313_v42  ;;  %v390_v53 = vmul.f32 0.375, %v352_v41  ;;  %v504_v54 = vmul.f32 0.125, %v466_v23  ;;  %v469_v27 = vld [vmem:[#allocation2 + $0x18b] sm:$0xff]  ;;  %v242_v36 = vld [vmem:[#allocation2 + $0x199] sm:$0xff] }
  0x78   :  { %v707_v51 = vadd.f32 %v669_v34, %v1115_v15  ;;  %v314_v57 = vadd.f32 %v276_v49, %v200_v43  ;;  %v638_v58 = vadd.f32 %v606_v19, %v1091_v63  ;;  %v201_v59 = vmul.f32 0.125, %v163_v44  ;;  %v356_v38 = vld [vmem:[#allocation2 + $0x19a] sm:$0xff] }
  0x79   :  { %v1123_v5 = vmul.f32 0.125, %v540_v45  ;;  %v541_v61 = vadd.f32 %v503_v40, %v427_v52  ;;  %v671_v62 = vadd.f32 %v637_v32, %v607_v47  ;;  %v608_v20 = vmul.f32 0.375, %v540_v45  ;;  %v470_v42 = vld [vmem:[#allocation2 + $0x19b] sm:$0xff] }
  0x7a   :  { %739 = vst.msk [vmem:[%s1188_s1 + $0xa8] sm:$0xff] %vm8_vm0, %v707_v51  ;;  %v277_v0 = vmul.f32 0.375, %v239_v50  ;;  %v428_v4 = vadd.f32 %v390_v53, %v314_v57  ;;  %v391_v6 = vmul.f32 0.375, %v353_v55  ;;  %v505_v7 = vmul.f32 0.125, %v467_v56  ;;  %v167_v45 = vld [vmem:[#allocation2 + $0x1a0] sm:$0xff] }
  0x7b   :  { %v708_v2 = vadd.f32 %v670_v46, %v1123_v5  ;;  %v1131_v63 = vmul.f32 0.125, %v541_v61  ;;  %v639_v10 = vadd.f32 %v607_v47, %v1099_v16  ;;  %v202_v11 = vmul.f32 0.125, %v164_v60  ;;  %v243_v51 = vld [vmem:[#allocation2 + $0x1a1] sm:$0xff] }
  0x7c   :  { %v315_v9 = vadd.f32 %v277_v0, %v201_v59  ;;  %v542_v13 = vadd.f32 %v504_v54, %v428_v4  ;;  %v672_v14 = vadd.f32 %v638_v58, %v608_v20  ;;  %v609_v3 = vmul.f32 0.375, %v541_v61  ;;  %v357_v52 = vld [vmem:[#allocation2 + $0x1a2] sm:$0xff]  ;;  %v168_v61 = vld [vmem:[#allocation2 + $0x1b0] sm:$0xff] }
  0x7d   :  { %740 = vst.msk [vmem:[%s1188_s1 + $0xb0] sm:$0xff] %vm8_vm0, %v708_v2  ;;  %v278_v17 = vmul.f32 0.375, %v240_v1  ;;  %v709_v21 = vadd.f32 %v671_v62, %v1131_v63  ;;  %v392_v24 = vmul.f32 0.375, %v354_v48  ;;  %v506_v25 = vmul.f32 0.125, %v468_v8  ;;  %v471_v57 = vld [vmem:[#allocation2 + $0x1a3] sm:$0xff]  ;;  %v244_v2 = vld [vmem:[#allocation2 + $0x1b1] sm:$0xff] }
  0x7e   :  { %v429_v22 = vadd.f32 %v391_v6, %v315_v9  ;;  %v1139_v16 = vmul.f32 0.125, %v542_v13  ;;  %v640_v29 = vadd.f32 %v608_v20, %v1107_v31  ;;  %v203_v30 = vmul.f32 0.125, %v165_v12  ;;  %v358_v4 = vld [vmem:[#allocation2 + $0x1b2] sm:$0xff] }
  0x7f   :  { %v316_v28 = vadd.f32 %v278_v17, %v202_v11  ;;  %741 = vst.msk [vmem:[%s1188_s1 + $0xb8] sm:$0xff] %vm8_vm0, %v709_v21  ;;  %v673_v19 = vadd.f32 %v639_v10, %v609_v3  ;;  %v610_v35 = vmul.f32 0.375, %v542_v13  ;;  %v279_v37 = vmul.f32 0.375, %v241_v18  ;;  %v472_v9 = vld [vmem:[#allocation2 + $0x1b3] sm:$0xff] }
  0x80   :  { %v543_v34 = vadd.f32 %v505_v7, %v429_v22  ;;  %v710_v39 = vadd.f32 %v672_v14, %v1139_v16  ;;  %v393_v41 = vmul.f32 0.375, %v355_v26  ;;  %v507_v23 = vmul.f32 0.125, %v469_v27  ;;  %v169_v13 = vld [vmem:[#allocation2 + $0x1b8] sm:$0xff] }
  0x81   :  { %v430_v40 = vadd.f32 %v392_v24, %v316_v28  ;;  %v317_v32 = vadd.f32 %v279_v37, %v203_v30  ;;  %v641_v43 = vadd.f32 %v609_v3, %v1115_v15  ;;  %v204_v44 = vmul.f32 0.125, %v166_v33  ;;  %v245_v21 = vld [vmem:[#allocation2 + $0x1b9] sm:$0xff] }
  0x82   :  { %v1147_v31 = vmul.f32 0.125, %v543_v34  ;;  %742 = vst.msk [vmem:[%s1188_s1 + $0xc0] sm:$0xff] %vm8_vm0, %v710_v39  ;;  %v674_v47 = vadd.f32 %v640_v29, %v610_v35  ;;  %v280_v49 = vmul.f32 0.375, %v242_v36  ;;  %v394_v50 = vmul.f32 0.375, %v356_v38  ;;  %v359_v22 = vld [vmem:[#allocation2 + $0x1ba] sm:$0xff] }
  0x83   :  { %v544_v46 = vadd.f32 %v506_v25, %v430_v40  ;;  %v431_v54 = vadd.f32 %v393_v41, %v317_v32  ;;  %v611_v55 = vmul.f32 0.375, %v543_v34  ;;  %v508_v56 = vmul.f32 0.125, %v470_v42  ;;  %v473_v33 = vld [vmem:[#allocation2 + $0x1bb] sm:$0xff] }
  0x84   :  { %v711_v53 = vadd.f32 %v673_v19, %v1147_v31  ;;  %v318_v58 = vadd.f32 %v280_v49, %v204_v44  ;;  %v642_v59 = vadd.f32 %v610_v35, %v1123_v5  ;;  %v205_v60 = vmul.f32 0.125, %v167_v45 }
  0x85   :  { %v680_v15 = vmul.f32 0.125, %v544_v46  ;;  %v545_v62 = vadd.f32 %v507_v23, %v431_v54  ;;  %v675_v20 = vadd.f32 %v641_v43, %v611_v55  ;;  %v281_v0 = vmul.f32 0.375, %v243_v51 }
  0x86   :  { %743 = vst.msk [vmem:[%s1188_s1 + $0xc8] sm:$0xff] %vm8_vm0, %v711_v53  ;;  %v395_v1 = vmul.f32 0.375, %v357_v52  ;;  %v432_v7 = vadd.f32 %v394_v50, %v318_v58  ;;  %v612_v48 = vmul.f32 0.375, %v544_v46  ;;  %v509_v8 = vmul.f32 0.125, %v471_v57 }
  0x87   :  { %v712_v6 = vadd.f32 %v680_v15, %v674_v47  ;;  %v681_v10 = vmul.f32 0.125, %v545_v62  ;;  %v319_v5 = vadd.f32 %v281_v0, %v205_v60  ;;  %v643_v11 = vadd.f32 %v611_v55, %v1131_v63 }
  0x88   :  { %v206_v12 = vmul.f32 0.125, %v168_v61  ;;  %v546_v14 = vadd.f32 %v508_v56, %v432_v7  ;;  %v676_v3 = vadd.f32 %v642_v59, %v612_v48  ;;  %v282_v17 = vmul.f32 0.375, %v244_v2 }
  0x89   :  { %744 = vst.msk [vmem:[%s1188_s1 + $0xd0] sm:$0xff] %vm8_vm0, %v712_v6  ;;  %v396_v18 = vmul.f32 0.375, %v358_v4  ;;  %v713_v24 = vadd.f32 %v681_v10, %v675_v20  ;;  %v433_v25 = vadd.f32 %v395_v1, %v319_v5  ;;  %v613_v26 = vmul.f32 0.375, %v545_v62 }
  0x8a   :  { %v510_v27 = vmul.f32 0.125, %v472_v9  ;;  %v682_v28 = vmul.f32 0.125, %v546_v14  ;;  %v320_v29 = vadd.f32 %v282_v17, %v206_v12  ;;  %v644_v63 = vadd.f32 %v612_v48, %v1139_v16 }
  0x8b   :  { %v207_v30 = vmul.f32 0.125, %v169_v13  ;;  %745 = vst.msk [vmem:[%s1188_s1 + $0xd8] sm:$0xff] %vm8_vm0, %v713_v24  ;;  %v547_v34 = vadd.f32 %v509_v8, %v433_v25  ;;  %v677_v19 = vadd.f32 %v643_v11, %v613_v26  ;;  %v283_v35 = vmul.f32 0.375, %v245_v21 }
  0x8c   :  { %v397_v37 = vmul.f32 0.375, %v359_v22  ;;  %v714_v36 = vadd.f32 %v682_v28, %v676_v3  ;;  %v434_v38 = vadd.f32 %v396_v18, %v320_v29  ;;  %v646_v39 = vmul.f32 0.375, %v546_v14 }
  0x8d   :  { %v683_v40 = vmul.f32 0.125, %v547_v34  ;;  %v321_v41 = vadd.f32 %v283_v35, %v207_v30  ;;  %v511_v23 = vmul.f32 0.125, %v473_v33  ;;  %v645_v42 = vadd.f32 %v613_v26, %v1147_v31 }
  0x8e   :  { %746 = vst.msk [vmem:[%s1188_s1 + $0xe0] sm:$0xff] %vm8_vm0, %v714_v36  ;;  %v548_v16 = vadd.f32 %v510_v27, %v434_v38  ;;  %v678_v32 = vadd.f32 %v646_v39, %v644_v63  ;;  %v647_v45 = vmul.f32 0.375, %v547_v34 }
  0x8f   :  { %v715_v43 = vadd.f32 %v683_v40, %v677_v19  ;;  %v435_v44 = vadd.f32 %v397_v37, %v321_v41 }
  0x90   :  { %v684_v46 = vmul.f32 0.125, %v548_v16  ;;  %v679_v49 = vadd.f32 %v647_v45, %v645_v42 }
  0x91   :  { %747 = vst.msk [vmem:[%s1188_s1 + $0xe8] sm:$0xff] %vm8_vm0, %v715_v43  ;;  %v549_v47 = vadd.f32 %v511_v23, %v435_v44 }
  0x92   :  { %v716_v50 = vadd.f32 %v684_v46, %v678_v32 }
  0x93   :  { %v685_v31 = vmul.f32 0.125, %v549_v47 }
  0x94   :  { %748 = vst.msk [vmem:[%s1188_s1 + $0xf0] sm:$0xff] %vm8_vm0, %v716_v50 }
  0x95   :  { %v717_v51 = vadd.f32 %v685_v31, %v679_v49 }
  0x97   :  { %749 = vst.msk [vmem:[%s1188_s1 + $0xf8] sm:$0xff] %vm8_vm0, %v717_v51 }

</bundles_post_ra>
